<compile_context>
chip_gen: v7x
topology: tpu7x:2x2x1
jax: 0.10.0
libtpu: 0.0.40
codegen_flags: <defaults>
</compile_context>

<pallas_src>
import functools

import jax
import jax.numpy as jnp
from jax.experimental import pallas as pl
from jax.experimental.pallas import tpu as pltpu

BN_EPS = 1e-5
_MIB = 1024 * 1024


# --------------------------------------------------------------------------- #
# Kernels
# --------------------------------------------------------------------------- #
def _bn_relu_epilogue(y, gb_ref):
    """Training-mode BatchNorm1d (full batch axis) fused with ReLU.

    Single-pass stats: mean and E[y^2] in one sweep, var = E[y^2] - mean^2
    (clamped at 0 for numerical safety), then one fused scale/shift/ReLU pass.
    """
    inv_b = 1.0 / y.shape[0]
    mean = jnp.sum(y, axis=0, keepdims=True) * inv_b
    var = jnp.maximum(jnp.sum(y * y, axis=0, keepdims=True) * inv_b - mean * mean, 0.0)
    scale = gb_ref[0:1, :] * jax.lax.rsqrt(var + BN_EPS)
    shift = gb_ref[1:2, :] - mean * scale
    return jnp.maximum(y * scale + shift, 0.0)


def _fwd_block_fast_kernel(x_ref, wt_ref, gb_ref, o_ref):
    """No reduction axis: one matmul over the full D_in, epilogue immediately."""
    y = jnp.dot(x_ref[...], wt_ref[...], preferred_element_type=jnp.float32)
    o_ref[...] = _bn_relu_epilogue(y, gb_ref).astype(o_ref.dtype)


def _fwd_block_ktiled_kernel(x_ref, wt_ref, gb_ref, o_ref):
    """Grid = (n feature tiles, k reduction tiles); accumulate directly in o_ref."""
    k = pl.program_id(1)

    @pl.when(k == 0)
    def _():
        o_ref[...] = jnp.zeros_like(o_ref)

    o_ref[...] += jnp.dot(x_ref[...], wt_ref[...], preferred_element_type=jnp.float32)

    @pl.when(k == pl.num_programs(1) - 1)
    def _():
        o_ref[...] = _bn_relu_epilogue(o_ref[...], gb_ref).astype(o_ref.dtype)


# --------------------------------------------------------------------------- #
# Planning helpers (trace-time Python, shapes are static under jit)
# --------------------------------------------------------------------------- #
def _vmem_caps():
    """Returns (tile_budget_bytes, vmem_limit_cap_bytes) per TPU generation."""
    try:
        phys = int(getattr(pltpu.get_tpu_info(), "vmem_capacity_bytes", 64 * _MIB))
    except Exception:  # pragma: no cover - conservative fallback
        phys = 64 * _MIB
    if phys <= 64 * _MIB:          # v7x-class: 64 MiB physical per TC
        return 44 * _MIB, 56 * _MIB
    return 100 * _MIB, 110 * _MIB  # v5e / v6e: 128 MiB physical


def _divisor_tiles(dim):
    """128-aligned tile sizes that divide dim, largest first; else full extent."""
    cands = [t for t in (1024, 512, 384, 256, 128) if dim % t == 0]
    return cands if cands else [dim]


def _choose_plan(B, D_in, D_out, budget):
    """Pick (mode, tn, tk, footprint_bytes) so double-buffered tiles fit VMEM."""
    tn_all = _divisor_tiles(D_out)
    # Prefer >= 2 feature tiles (lets "parallel" shard across v7x's two TCs).
    tn_pref = [t for t in tn_all if D_out // t >= 2]
    tn_order = tn_pref + [t for t in tn_all if t not in tn_pref]

    def fast_bytes(tn):
        # x resident + double-buffered W_T / out tiles + packed params.
        return 4 * (2 * B * D_in + 2 * D_in * tn + 2 * B * tn + 4 * tn)

    def ktiled_bytes(tn, tk):
        return 4 * (2 * B * tk + 2 * tk * tn + 2 * B * tn + 4 * tn)

    # Fast path: full-D_in tiles, no reduction axis.
    for tn in tn_order:
        fb = fast_bytes(tn)
        if fb <= budget:
            return "fast", tn, D_in, fb

    # General path: k-tiled reduction (x no longer fits resident).
    tk_all = _divisor_tiles(D_in)
    for tn in tn_order:
        for tk in tk_all:
            kb = ktiled_bytes(tn, tk)
            if kb <= budget:
                return "ktiled", tn, tk, kb

    # Fallback: smallest available tiles (may spill, but compiles).
    tn, tk = tn_all[-1], tk_all[-1]
    return "ktiled", tn, tk, ktiled_bytes(tn, tk)


# --------------------------------------------------------------------------- #
# Public wrapper
# --------------------------------------------------------------------------- #
@functools.partial(jax.jit, static_argnames=("use_bf16",))
def forward_block(x, w_t, gamma, beta, *, use_bf16=False):
    """Forward_Block forward pass (training-mode BatchNorm semantics).

    x:     (B, D_in)      float32
    w_t:   (D_in, D_out)  float32  -- nn.Linear weight, transposed ONCE at setup.
    gamma: (D_out,)       float32  -- BatchNorm1d weight.
    beta:  (D_out,)       float32  -- BatchNorm1d bias.

    The Linear bias is not an input: train-mode BN centering removes it exactly.
    BN statistics are per-feature over the FULL batch, so the batch axis is
    never tiled and the tiled result is bit-for-bit the untiled computation.
    """
    B, D_in = x.shape
    D_out = w_t.shape[1]

    budget, limit_cap = _vmem_caps()
    mode, tn, tk, foot = _choose_plan(B, D_in, D_out, budget)

    # Packed BN params: row 0 = gamma, row 1 = beta.
    gb = jnp.stack([gamma, beta], axis=0)  # (2, D_out)

    if use_bf16:
        # MXU is natively bf16; accumulation stays f32 via preferred_element_type.
        x = x.astype(jnp.bfloat16)
        w_t = w_t.astype(jnp.bfloat16)

    cost = pl.CostEstimate(
        flops=2 * B * D_in * D_out,
        transcendentals=0,
        bytes_accessed=x.dtype.itemsize * (B * D_in + D_in * D_out)
        + 4 * (B * D_out + 2 * D_out),
    )

    if mode == "fast":
        grid = (D_out // tn,)
        dims = ("parallel",)
        kernel = _fwd_block_fast_kernel
        in_specs = [
            pl.BlockSpec((B, D_in), lambda n: (0, 0)),   # x: resident, one DMA
            pl.BlockSpec((D_in, tn), lambda n: (0, n)),  # W_T column tile
            pl.BlockSpec((2, tn), lambda n: (0, n)),     # packed gamma/beta
        ]
        out_spec = pl.BlockSpec((B, tn), lambda n: (0, n))
    else:
        grid = (D_out // tn, D_in // tk)
        dims = ("parallel", "arbitrary")
        kernel = _fwd_block_ktiled_kernel
        in_specs = [
            pl.BlockSpec((B, tk), lambda n, k: (0, k)),   # x K-tile
            pl.BlockSpec((tk, tn), lambda n, k: (k, n)),  # W_T tile
            pl.BlockSpec((2, tn), lambda n, k: (0, n)),   # packed gamma/beta
        ]
        out_spec = pl.BlockSpec((B, tn), lambda n, k: (0, n))

    compiler_kwargs = dict(dimension_semantics=dims)
    if foot > 16 * _MIB:  # above the smallest (v5e) scoped default -> raise limit
        compiler_kwargs["vmem_limit_bytes"] = int(
            min(max(foot * 1.3, 32 * _MIB), limit_cap)
        )

    return pl.pallas_call(
        kernel,
        out_shape=jax.ShapeDtypeStruct((B, D_out), jnp.float32),
        grid_spec=pltpu.PrefetchScalarGridSpec(
            num_scalar_prefetch=0,
            grid=grid,
            in_specs=in_specs,
            out_specs=out_spec,
        ),
        compiler_params=pltpu.CompilerParams(**compiler_kwargs),
        cost_estimate=cost,
    )(x, w_t, gb)


# --------------------------------------------------------------------------- #
# Reference + self-check
# --------------------------------------------------------------------------- #
def reference(x, w, b, gamma, beta):
    y = x @ w.T + b
    mean = jnp.mean(y, axis=0, keepdims=True)
    var = jnp.mean((y - mean) ** 2, axis=0, keepdims=True)
    y = gamma * (y - mean) / jnp.sqrt(var + BN_EPS) + beta
    return jnp.maximum(y, 0.0)


if __name__ == "__main__":
    # Module defaults: input_dim=128, output_dim=128; small batch for the check.
    B, D_in, D_out = 8, 128, 128

    key = jax.random.PRNGKey(0)
    kx, kw, kb = jax.random.split(key, 3)

    x = jax.random.normal(kx, (B, D_in), dtype=jnp.float32)

    # Deterministic parameter init (shapes per nn.Linear / nn.BatchNorm1d).
    bound = 1.0 / (D_in ** 0.5)
    w = jax.random.uniform(kw, (D_out, D_in), jnp.float32, -bound, bound)
    b = jax.random.uniform(kb, (D_out,), jnp.float32, -bound, bound)
    gamma = jnp.ones((D_out,), jnp.float32)   # BatchNorm1d weight init
    beta = jnp.zeros((D_out,), jnp.float32)   # BatchNorm1d bias init

    # Setup-time transpose (hoisted out of the per-call path).
    w_t = jnp.asarray(w.T)                    # (D_in, D_out)

    out = forward_block(x, w_t, gamma, beta)
    out = jax.block_until_ready(out)

    ref = reference(x, w, b, gamma, beta)     # reference keeps the bias; BN cancels it
    assert jnp.allclose(out, ref, atol=2e-4, rtol=2e-4), "mismatch vs reference"

    print("KERNEL_OK")
</pallas_src>

<mosaic_0001>
module attributes {stable_mosaic.version = 11 : i64} {
  func.func @_fwd_block_fast_kernel(%arg0: i32, %arg1: memref<8x128xf32, #tpu.memory_space<vmem>>, %arg2: memref<128x128xf32, #tpu.memory_space<vmem>>, %arg3: memref<2x128xf32, #tpu.memory_space<vmem>>, %arg4: memref<8x128xf32, #tpu.memory_space<vmem>>) attributes {dimension_semantics = [#tpu.dimension_semantics<parallel>], iteration_bounds = array<i64: 1>, scalar_prefetch = 0 : i64, scratch_operands = 0 : i64, tpu.core_type = #tpu.core_type<tc>, window_params = [{pipeline_mode = #tpu.pipeline_mode<synchronous>, transform_indices = @transform_0, window_bounds = array<i64: 8, 128>}, {transform_indices = @transform_1, window_bounds = array<i64: 128, 128>}, {transform_indices = @transform_2, window_bounds = array<i64: 2, 128>}, {transform_indices = @transform_3, window_bounds = array<i64: 8, 128>}]} {
    %c0 = arith.constant 0 : index
    %c0_0 = arith.constant 0 : index
    %0 = vector.load %arg1[%c0, %c0_0] : memref<8x128xf32, #tpu.memory_space<vmem>>, vector<8x128xf32>
    %c0_1 = arith.constant 0 : index
    %c0_2 = arith.constant 0 : index
    %1 = vector.load %arg2[%c0_1, %c0_2] : memref<128x128xf32, #tpu.memory_space<vmem>>, vector<128x128xf32>
    %cst = arith.constant dense<0.000000e+00> : vector<8x128xf32>
    %2 = tpu.matmul %0, %1, %cst {dimension_numbers = #tpu.dot_dimension_numbers<[1], [0], [0], [1], [0, 0, 1, 1], [], []>} : vector<8x128xf32>, vector<128x128xf32>, vector<8x128xf32> -> vector<8x128xf32>
    %cst_3 = arith.constant dense<0.000000e+00> : vector<128xf32>
    %3 = vector.multi_reduction <add>, %2, %cst_3 [0] : vector<8x128xf32> to vector<128xf32>
    %4 = vector.shape_cast %3 : vector<128xf32> to vector<1x128xf32>
    %cst_4 = arith.constant 1.250000e-01 : f32
    %5 = vector.broadcast %cst_4 : f32 to vector<1x128xf32>
    %6 = arith.mulf %4, %5 : vector<1x128xf32>
    %7 = arith.mulf %2, %2 : vector<8x128xf32>
    %cst_5 = arith.constant dense<0.000000e+00> : vector<128xf32>
    %8 = vector.multi_reduction <add>, %7, %cst_5 [0] : vector<8x128xf32> to vector<128xf32>
    %9 = vector.shape_cast %8 : vector<128xf32> to vector<1x128xf32>
    %cst_6 = arith.constant 1.250000e-01 : f32
    %10 = vector.broadcast %cst_6 : f32 to vector<1x128xf32>
    %11 = arith.mulf %9, %10 : vector<1x128xf32>
    %12 = arith.mulf %6, %6 : vector<1x128xf32>
    %13 = arith.subf %11, %12 : vector<1x128xf32>
    %cst_7 = arith.constant 0.000000e+00 : f32
    %14 = vector.broadcast %cst_7 : f32 to vector<1x128xf32>
    %15 = arith.maximumf %13, %14 : vector<1x128xf32>
    %c0_8 = arith.constant 0 : index
    %c0_9 = arith.constant 0 : index
    %16 = vector.load %arg3[%c0_8, %c0_9] : memref<2x128xf32, #tpu.memory_space<vmem>>, vector<1x128xf32>
    %cst_10 = arith.constant 9.99999974E-6 : f32
    %17 = vector.broadcast %cst_10 : f32 to vector<1x128xf32>
    %18 = arith.addf %15, %17 : vector<1x128xf32>
    %19 = math.rsqrt %18 : vector<1x128xf32>
    %20 = arith.mulf %16, %19 : vector<1x128xf32>
    %c1 = arith.constant 1 : index
    %c0_11 = arith.constant 0 : index
    %21 = vector.load %arg3[%c1, %c0_11] : memref<2x128xf32, #tpu.memory_space<vmem>>, vector<1x128xf32>
    %22 = arith.mulf %6, %20 : vector<1x128xf32>
    %23 = arith.subf %21, %22 : vector<1x128xf32>
    %24 = vector.broadcast %20 : vector<1x128xf32> to vector<8x128xf32>
    %25 = arith.mulf %2, %24 : vector<8x128xf32>
    %26 = vector.broadcast %23 : vector<1x128xf32> to vector<8x128xf32>
    %27 = arith.addf %25, %26 : vector<8x128xf32>
    %cst_12 = arith.constant 0.000000e+00 : f32
    %28 = vector.broadcast %cst_12 : f32 to vector<8x128xf32>
    %29 = arith.maximumf %27, %28 : vector<8x128xf32>
    %c0_13 = arith.constant 0 : index
    %c0_14 = arith.constant 0 : index
    %30 = vector.load %arg4[%c0_13, %c0_14] : memref<8x128xf32, #tpu.memory_space<vmem>>, vector<8x128xf32>
    tpu.vector_store %arg4[%c0_13, %c0_14], %29 {strides = array<i32>} : memref<8x128xf32, #tpu.memory_space<vmem>>, vector<8x128xf32>,
    return
  }
  func.func @transform_0(%arg0: i32) -> (i32, i32) {
    %c0_i32 = arith.constant 0 : i32
    %c0_i32_0 = arith.constant 0 : i32
    %c0_i32_1 = arith.constant 0 : i32
    return %c0_i32, %c0_i32_0 : i32, i32
  }
  func.func @transform_1(%arg0: i32) -> (i32, i32) {
    %c0_i32 = arith.constant 0 : i32
    %c0_i32_0 = arith.constant 0 : i32
    return %c0_i32, %arg0 : i32, i32
  }
  func.func @transform_2(%arg0: i32) -> (i32, i32) {
    %c0_i32 = arith.constant 0 : i32
    %c0_i32_0 = arith.constant 0 : i32
    return %c0_i32, %arg0 : i32, i32
  }
  func.func @transform_3(%arg0: i32) -> (i32, i32) {
    %c0_i32 = arith.constant 0 : i32
    %c0_i32_0 = arith.constant 0 : i32
    return %c0_i32, %arg0 : i32, i32
  }
}

</mosaic_0001>

<bundles_post_ra>
// kernel: forward_block.1
= control target key start
LH: loop header
LB: loop body
LE: loop exit
PB: predicated region body
PF: predicated region fallthrough
CT: control target
= control target key end

     0   :  { %8 = vsyncpa [#allocation3], 0  ;;  %s361_s0 = inlined_call_operand.vmem [shape: f32[8,128], index: 0, kind: input, shape index: {}]   ;;  %s362_s1 = inlined_call_operand.hbm [shape: f32[128,128], index: 1, kind: input, shape index: {}]   ;;  %s363_s2 = inlined_call_operand.vmem [shape: f32[2,128], index: 2, kind: input, shape index: {}]   ;;  %s364_s3 = inlined_call_operand.hbm [shape: f32[8,128], index: 3, kind: output, shape index: {}]  }
   0x1   :  { %9 = vsyncpa [#allocation4], 0  ;;  %s301_s12 = smov [#allocation2]   ;;  %s253_s16 = scalar_lea.hbm %s362_s1, 2048 }
   0x2   :  { %s17_s13 = sshll.u32 %s301_s12, 4  ;;  %p254_p0 = scmp.ne.s32.totalorder %s362_s1, %s253_s16  ;;  %s18_s13 = int_to_ptr.vmem [resolvable:$true] %s17_s13 }
   0x3   :  { %p257_p1 = scmp.lt.u32.totalorder %s253_s16, %s362_s1 }
   0x5   :  { %p259_p2 = pnand %p257_p1, %p254_p0 }
   0x7   :  { %262 = shalt.err (!%p259_p2)
}
   0x8   :  { %s263_s21 = scalar_lea.vmem %s18_s13, 2048  ;;  %p268_p4 = scmp.lt.s32.totalorder %s18_s13, %s18_s13 }
   0x9   :  { %p264_p3 = scmp.ne.s32.totalorder %s18_s13, %s263_s21  ;;  %p269_p5 = scmp.lt.s32.totalorder %s263_s21, %s263_s21 }
   0xb   :  { %p270_p6 = por %p269_p5, %p268_p4 }
   0xd   :  { %p271_p7 = pnand %p270_p6, %p264_p3 }
   0xf   :  { %274 = shalt.err (!%p271_p7)
}
  0x10   :  { %s302_s22 = smov 128   ;;  %s303_s23 = smov 8  }
  0x11   :  { %23 = dma.hbm_to_vmem [thread:$0]  %s362_s1, 2048, %s18_s13, [#allocation3], %s302_s22, %s302_s22, %s303_s23  }
  0x12   :  { %297 = dma.done.wait [#allocation3], 2048  }
  0x13   :  { %298 = vsyncadd [#allocation3], 4294965248  ;;  %v304_v0 = vmov 0.0|0.0   ;;  %vm305_vm0 = vmmov 0   ;;  %v306_v1 = vmov 0.0   ;;  %v30_v2 = vld [vmem:[#allocation2] sm:$0xff]  ;;  %v141_v48 = vlaneseq }
  0x14   :  { %220 = vmatprep.subr.bf16.mxu0 %v304_v0  ;;  %217 = vmatprep.mubr.msk.f32.mxu0 %vm305_vm0, %v306_v1  ;;  %v31_v3 = vld [vmem:[#allocation2 + $0x8] sm:$0xff]  ;;  %v32_v4 = vld [vmem:[#allocation2 + $0x10] sm:$0xff]  ;;  %v33_v6 = vld [vmem:[#allocation2 + $0x18] sm:$0xff]  ;;  %s307_s30 = smov [#allocation5]  }
  0x15   :  { %v221_v5 = vpack.c.bf16 %v31_v3, %v30_v2  ;;  %v224_v7 = vpack.c.bf16 %v33_v6, %v32_v4  ;;  %v34_v8 = vld [vmem:[#allocation2 + $0x20] sm:$0xff]  ;;  %v35_v9 = vld [vmem:[#allocation2 + $0x28] sm:$0xff]  ;;  %v36_v11 = vld [vmem:[#allocation2 + $0x30] sm:$0xff]  ;;  %v142_v49 = vshrl.u32 %v141_v48, 7  ;;  %s159_s4 = sshll.u32 %s307_s30, 4  ;;  %s160_s4 = int_to_ptr.vmem [resolvable:$true] %s159_s4 }
  0x16   :  { %v227_v10 = vpack.c.bf16 %v35_v9, %v34_v8  ;;  %v37_v12 = vld [vmem:[#allocation2 + $0x38] sm:$0xff]  ;;  %v38_v14 = vld [vmem:[#allocation2 + $0x40] sm:$0xff]  ;;  %v39_v15 = vld [vmem:[#allocation2 + $0x48] sm:$0xff]  ;;  %s275_s5 = scalar_lea.vmem %s160_s4, 128  ;;  %p280_p9 = scmp.lt.s32.totalorder %s160_s4, %s160_s4 }
  0x17   :  { %222 = vmatpush3.bf16.msra.mxu0 %v221_v5  ;;  %v230_v13 = vpack.c.bf16 %v37_v12, %v36_v11  ;;  %v233_v16 = vpack.c.bf16 %v39_v15, %v38_v14  ;;  %v40_v17 = vld [vmem:[#allocation2 + $0x50] sm:$0xff]  ;;  %v41_v18 = vld [vmem:[#allocation2 + $0x58] sm:$0xff]  ;;  %v42_v20 = vld [vmem:[#allocation2 + $0x60] sm:$0xff]  ;;  %v143_v51 = vsub.s32 0, %v142_v49  ;;  %p276_p8 = scmp.ne.s32.totalorder %s160_s4, %s275_s5  ;;  %p281_p10 = scmp.lt.s32.totalorder %s275_s5, %s275_s5 }
  0x18   :  { %223 = vmatprep.subr.bf16.mxu0 %v304_v0  ;;  %v236_v19 = vpack.c.bf16 %v41_v18, %v40_v17  ;;  %v43_v21 = vld [vmem:[#allocation2 + $0x68] sm:$0xff]  ;;  %v44_v23 = vld [vmem:[#allocation2 + $0x70] sm:$0xff]  ;;  %v45_v24 = vld [vmem:[#allocation2 + $0x78] sm:$0xff] }
  0x19   :  { %v239_v22 = vpack.c.bf16 %v43_v21, %v42_v20  ;;  %v242_v25 = vpack.c.bf16 %v45_v24, %v44_v23  ;;  %v29_v26 = vld [vmem:[%s361_s0] sm:$0xff]  ;;  %p282_p11 = por %p281_p10, %p280_p9 }
  0x1a   :  { %v134_v50 = vld [vmem:[%s363_s2] sm:$0x1]  ;;  %v138_v54 = vld [vmem:[%s363_s2 + $0x1] sm:$0x1] }
  0x1b   :  { %225 = vmatpush3.bf16.msra.mxu0 %v224_v7  ;;  %p283_p12 = pnand %p282_p11, %p276_p8 }
  0x1c   :  { %226 = vmatprep.subr.bf16.mxu0 %v304_v0 }
  0x1f   :  { %228 = vmatpush3.bf16.msra.mxu0 %v227_v10 }
  0x20   :  { %229 = vmatprep.subr.bf16.mxu0 %v304_v0 }
  0x23   :  { %231 = vmatpush3.bf16.msra.mxu0 %v230_v13 }
  0x24   :  { %232 = vmatprep.subr.bf16.mxu0 %v304_v0 }
  0x27   :  { %234 = vmatpush3.bf16.msra.mxu0 %v233_v16 }
  0x28   :  { %235 = vmatprep.subr.bf16.mxu0 %v304_v0 }
  0x2b   :  { %237 = vmatpush3.bf16.msra.mxu0 %v236_v19 }
  0x2c   :  { %238 = vmatprep.subr.bf16.mxu0 %v304_v0 }
  0x2f   :  { %240 = vmatpush3.bf16.msra.mxu0 %v239_v22 }
  0x30   :  { %241 = vmatprep.subr.bf16.mxu0 %v304_v0 }
  0x33   :  { %243 = vmatpush3.bf16.msra.mxu0 %v242_v25 }
  0x36   :  { %218 = vmatmul.mubr.f32.vlgmr.msra.gmra.mrb[0].mxu0 %v29_v26 }
 0x109   :  { %v112_v27 = vpop.f32.mrb[0].mxu0 }
 0x10a   :  { %v116_v28 = vrot.slane %v112_v27, 4  ;;  %v123_v29 = vmul.f32 %v112_v27, %v112_v27  ;;  %v219_v30 = vpop.f32.mrb[1].mxu0 }
 0x10c   :  { %v117_v31 = vadd.f32 %v116_v28, %v112_v27  ;;  %v124_v32 = vrot.slane %v123_v29, 4 }
 0x10e   :  { %v118_v33 = vrot.slane %v117_v31, 2  ;;  %v125_v34 = vadd.f32 %v124_v32, %v123_v29 }
 0x110   :  { %v119_v35 = vadd.f32 %v118_v33, %v117_v31  ;;  %v126_v36 = vrot.slane %v125_v34, 2 }
 0x112   :  { %v120_v37 = vrot.slane %v119_v35, 1  ;;  %v127_v38 = vadd.f32 %v126_v36, %v125_v34 }
 0x114   :  { %v121_v39 = vadd.f32 %v120_v37, %v119_v35  ;;  %v128_v40 = vrot.slane %v127_v38, 1 }
 0x116   :  { %v122_v41 = vmul.f32 0.125, %v121_v39  ;;  %v129_v42 = vadd.f32 %v128_v40, %v127_v38 }
 0x118   :  { %v130_v43 = vmul.f32 0.125, %v129_v42  ;;  %v131_v44 = vmul.f32 %v122_v41, %v122_v41 }
 0x11a   :  { %v132_v45 = vsub.f32 %v130_v43, %v131_v44 }
 0x11c   :  { %v133_v46 = vmax.f32 %v132_v45, 0.0 }
 0x11e   :  { %v135_v47 = vadd.f32 1e-05, %v133_v46 }
 0x120   :  { %251 = vrsqrt.f32 %v135_v47 }
 0x12a   :  { %v252_v52 = vpop.eup %251 }
 0x12b   :  { %v137_v53 = vmul.f32 %v252_v52, %v134_v50 }
 0x12d   :  { %v144_v55 = vrot.slane %v137_v53, %v143_v51  ;;  %v139_v56 = vmul.f32 %v137_v53, %v122_v41 }
 0x12f   :  { %v140_v57 = vsub.f32 %v138_v54, %v139_v56  ;;  %v145_v58 = vmul.f32 %v144_v55, %v112_v27 }
 0x131   :  { %v149_v59 = vrot.slane %v140_v57, %v143_v51 }
 0x133   :  { %v150_v60 = vadd.f32 %v149_v59, %v145_v58 }
 0x135   :  { %v151_v61 = vmax.f32 %v150_v60, 0.0 }
 0x137   :  { %152 = vst [vmem:[#allocation5] sm:$0xff] %v151_v61 }
 0x138   :  { %286 = shalt.err (!%p283_p12)
}
 0x139   :  { %s287_s7 = scalar_lea.hbm %s364_s3, 128 }
 0x13a   :  { %p288_p13 = scmp.ne.s32.totalorder %s364_s3, %s287_s7  ;;  %p291_p0 = scmp.lt.u32.totalorder %s287_s7, %s364_s3 }
 0x13c   :  { %p293_p1 = pnand %p291_p0, %p288_p13 }
 0x13e   :  { %296 = shalt.err (!%p293_p1)
}
 0x13f   :  { %162 = dma.vmem_to_hbm [thread:$0]  %s160_s4, 128, %s364_s3, [#allocation4]  }
 0x140   :  { %299 = dma.done.wait [#allocation4], 128  }
 0x141   :  { %300 = vsyncadd [#allocation4], 4294967168 }
 0x142   :  { %166 = vsyncpa [#allocation3], 1 }
 0x143   :  { %167 = vsyncpa [#allocation4], 1 }

</bundles_post_ra>
